<compile_context>
chip_gen: v6e
topology: v6e:2x2x1
jax: 0.10.0
libtpu: 0.0.40
codegen_flags: <defaults>
</compile_context>

<pallas_src>
import functools

import jax
import jax.numpy as jnp
from jax import lax
from jax.experimental import pallas as pl
from jax.experimental.pallas import tpu as pltpu

LN_EPS = 1e-5     # nn.LayerNorm default eps
COS_EPS = 1e-8    # F.cosine_similarity default eps


def _round_up(n, m):
    return ((n + m - 1) // m) * m


# ----------------------------------------------------------------------------- kernel

def _rpq_body(x_ref, proj_ref, cbd_ref, nexp_ref, idx_ref, dist_ref, *,
              num_codebooks, c_pad, valid_c):
    """x_ref:(TR,D)   proj_ref:(D,H*K)   cbd_ref:(H*K, H*C_pad) block-diag unit-norm codebook
    nexp_ref:(H*K,H*K) block-of-ones or None   idx_ref:(H,TR) i32   dist_ref:(H,TR,C) or None."""
    x = x_ref[...].astype(jnp.float32)                                    # (TR, D)

    # LayerNorm over the feature dim, no affine, biased variance (== nn.LayerNorm).
    mean = jnp.mean(x, axis=-1, keepdims=True)
    var = jnp.mean(jnp.square(x - mean), axis=-1, keepdims=True)
    xn = (x - mean) * lax.rsqrt(var + LN_EPS)

    # Random projection fused across ALL codebooks: one MXU launch with N = H*K.
    v = jnp.dot(xn, proj_ref[...], preferred_element_type=jnp.float32)    # (TR, H*K)

    # Per-(row, codebook) L2 normalisation -- only needed when true cosine values are
    # emitted (argmax is invariant to a positive per-row rescale).  The per-h sum of
    # squares is broadcast back to all K lanes of that codebook by a tiny
    # block-of-ones matmul, so v is never sliced into 16-lane-wide pieces.
    if nexp_ref is not None:
        ssq = jnp.dot(v * v, nexp_ref[...], preferred_element_type=jnp.float32)
        v = v * lax.rsqrt(jnp.maximum(ssq, jnp.float32(COS_EPS * COS_EPS)))

    # Cosine similarities for all codebooks in one MXU launch against the
    # block-diagonal codebook (contraction dim first, C_pad lane-dense).
    cos_all = jnp.dot(v, cbd_ref[...], preferred_element_type=jnp.float32)  # (TR, H*C_pad)

    tr = cos_all.shape[0]
    pad_cols = valid_c != c_pad
    # Hoisted once per tile, shared by every codebook (JAX does not CSE iota).
    col = lax.broadcasted_iota(jnp.int32, (tr, c_pad), 1)
    valid = (col < valid_c) if pad_cols else None

    for h in range(num_codebooks):                       # H is small & static -> unrolled
        cos = cos_all[:, h * c_pad:(h + 1) * c_pad]      # lane-aligned slice, f32
        if dist_ref is not None:
            sl = cos[:, :valid_c] if pad_cols else cos
            dist_ref[h] = sl.astype(dist_ref.dtype)      # f32 -> (bf16) downcast at store
        # argmax over the codebook axis (first occurrence on ties, like torch), with the
        # zero-padded codebook columns masked so they can never win.
        cos_m = jnp.where(valid, cos, -jnp.inf) if pad_cols else cos
        maxv = jnp.max(cos_m, axis=-1, keepdims=True)
        idx = jnp.min(jnp.where(cos_m == maxv, col, jnp.int32(c_pad)), axis=-1)
        idx_ref[h] = idx                                  # (TR,) int32


def _rpq_kernel_dist(x_ref, proj_ref, cbd_ref, nexp_ref, idx_ref, dist_ref, **kw):
    _rpq_body(x_ref, proj_ref, cbd_ref, nexp_ref, idx_ref, dist_ref, **kw)


def _rpq_kernel_idx(x_ref, proj_ref, cbd_ref, idx_ref, **kw):
    _rpq_body(x_ref, proj_ref, cbd_ref, None, idx_ref, None, **kw)


# ----------------------------------------------------------------------------- wrapper

def random_projection_quantizer_v2(x, rand_projs, codebook, return_distances=True,
                                   distances_dtype=jnp.bfloat16):
    """x: (B, T, D); rand_projs: (H, D, K); codebook: (H, C, K) (re-normalised here)."""
    B, T, D = x.shape
    H, _, K = rand_projs.shape
    C = codebook.shape[1]
    BT = B * T
    HK = H * K
    C_pad = _round_up(C, 128)

    # ---- generation-aware VMEM budget ------------------------------------------------
    vmem_cap = 64 << 20
    try:
        vmem_cap = int(pltpu.get_tpu_info().vmem_capacity_bytes)
    except Exception:
        pass
    # Leave headroom below physical VMEM (compiler scratch, semaphores); v7x (64 MiB)
    # gets ~56 MiB, 128-MiB parts get 100 MiB.
    vmem_limit = int(max(32 << 20, min(vmem_cap - (8 << 20), 100 << 20)))
    budget = vmem_limit - (4 << 20)

    x_isz = jnp.dtype(x.dtype).itemsize
    d_isz = jnp.dtype(distances_dtype).itemsize

    def vmem_estimate(tr):
        x_t = 2 * tr * D * x_isz                            # streamed input (2 buffers)
        xf = 2 * tr * D * 4                                 # f32 + normalised temporaries
        cos_t = tr * H * C_pad * 4 + tr * C_pad * 4         # cos_all + one masked copy
        idx_t = 2 * H * tr * 4
        dist_t = (2 * H * tr * C * d_isz) if return_distances else 0
        # Resident blocks charged x2 (default double-buffering). pl.Buffered(1) on the
        # constant-index_map inputs could reclaim this, but they are small vs the tile.
        resident = 2 * (D * HK * 4 + HK * H * C_pad * 4 + HK * HK * 4)
        return x_t + xf + cos_t + idx_t + dist_t + resident

    if BT < 128:
        TR = BT                                             # single full-extent block
    else:
        TR = 1024 if vmem_cap >= (96 << 20) else 512        # bigger tiles on 128-MiB parts
        while TR > 128 and vmem_estimate(TR) > budget:
            TR //= 2
        TR = max(128, min(TR, (BT // 128) * 128))           # 128-aligned, <= BT
        # Give multi-TensorCore parts (v7x) at least 2 row tiles to shard over.
        while TR > 128 and pl.cdiv(BT, TR) < 2:
            TR = max(128, ((TR // 2) // 128) * 128)
    # Trailing partial row tile (BT % TR != 0) is handled by the pipeline:
    # out-of-bounds rows read unspecified values and their writes are dropped.
    grid = (pl.cdiv(BT, TR),)

    # ---- constant prep on the wrapper side (tiny next to the kernel traffic) ---------
    x2d = x.reshape(BT, D)                                  # native dtype, no pad / cast
    proj_all = jnp.transpose(rand_projs, (1, 0, 2)).reshape(D, HK).astype(jnp.float32)

    # Re-normalise the codebook (like F.cosine_similarity does) so the kernel can use the
    # unit-norm shortcut regardless of what the caller passes.
    cb32 = codebook.astype(jnp.float32)
    cb_unit = cb32 * lax.rsqrt(jnp.maximum(jnp.sum(cb32 * cb32, axis=-1, keepdims=True),
                                           jnp.float32(COS_EPS * COS_EPS)))
    cb_t = jnp.transpose(cb_unit, (0, 2, 1))                # (H, K, C): contraction dim first
    if C_pad != C:
        cb_t = jnp.pad(cb_t, ((0, 0), (0, 0), (0, C_pad - C)))
    eye = jnp.eye(H, dtype=jnp.float32)
    # Block-diagonal codebook (H*K, H*C_pad): one fused cosine matmul for all codebooks.
    cbd = (eye[:, None, :, None] * cb_t[:, :, None, :]).reshape(HK, H * C_pad)

    x_spec = pl.BlockSpec((TR, D), lambda r: (r, 0))
    proj_spec = pl.BlockSpec((D, HK), lambda r: (0, 0))          # resident (DMA'd once)
    cbd_spec = pl.BlockSpec((HK, H * C_pad), lambda r: (0, 0))   # resident (DMA'd once)
    idx_spec = pl.BlockSpec((H, TR), lambda r: (0, r))
    idx_shape = jax.ShapeDtypeStruct((H, BT), jnp.int32)

    params = pltpu.CompilerParams(
        dimension_semantics=("parallel",),                  # lets v7x shard across its 2 TCs
        vmem_limit_bytes=vmem_limit,
    )
    kw = dict(num_codebooks=H, c_pad=C_pad, valid_c=C)

    if return_distances:
        nexp = jnp.kron(eye, jnp.ones((K, K), jnp.float32))      # (H*K, H*K) block-of-ones
        nexp_spec = pl.BlockSpec((HK, HK), lambda r: (0, 0))     # resident
        dist_spec = pl.BlockSpec((H, TR, C), lambda r: (0, r, 0))
        # TODO(synk): torch returns float32 distances; bf16 halves the dominant HBM
        # writeback (per perf review) -- pass distances_dtype=jnp.float32 to match exactly.
        dist_shape = jax.ShapeDtypeStruct((H, BT, C), distances_dtype)
        idx_hp, dist_p = pl.pallas_call(
            functools.partial(_rpq_kernel_dist, **kw),
            grid=grid,
            in_specs=[x_spec, proj_spec, cbd_spec, nexp_spec],
            out_specs=(idx_spec, dist_spec),
            out_shape=(idx_shape, dist_shape),
            compiler_params=params,
        )(x2d, proj_all, cbd, nexp)
        distances = dist_p.reshape(H, B, T, C)                   # contiguous (free) reshape
        indices = jnp.transpose(idx_hp.reshape(H, B, T), (1, 2, 0))
        # TODO(synk): torch argmax yields int64 indices; emitted as int32 (TPU-native).
        return indices, distances

    idx_hp = pl.pallas_call(
        functools.partial(_rpq_kernel_idx, **kw),
        grid=grid,
        in_specs=[x_spec, proj_spec, cbd_spec],
        out_specs=idx_spec,
        out_shape=idx_shape,
        compiler_params=params,
    )(x2d, proj_all, cbd)
    indices = jnp.transpose(idx_hp.reshape(H, B, T), (1, 2, 0))
    return indices


# ----------------------------------------------------------------------------- tests

def _reference(x, rand_projs, cb):
    """Plain-JAX transcription of the torch forward."""
    mean = x.mean(-1, keepdims=True)
    var = ((x - mean) ** 2).mean(-1, keepdims=True)
    xn = (x - mean) / jnp.sqrt(var + LN_EPS)
    proj_x = jnp.einsum("btd,hdk->hbtk", xn, rand_projs)                   # (H,B,T,K)
    v_n = jnp.maximum(jnp.linalg.norm(proj_x, axis=-1, keepdims=True), COS_EPS)
    c_n = jnp.maximum(jnp.linalg.norm(cb, axis=-1, keepdims=True), COS_EPS)
    cos = jnp.einsum("hbtk,hck->hbtc", proj_x / v_n, cb / c_n)             # (H,B,T,C)
    idx = jnp.transpose(jnp.argmax(cos, axis=-1), (1, 2, 0)).astype(jnp.int32)
    return idx, cos


def _check_indices(indices, cos_r, idx_r):
    # Robust to numerical near-ties: the chosen codeword must achieve the reference max
    # cosine (up to f32 matmul noise), and nearly all indices must match exactly.
    idx_hbt = jnp.transpose(indices, (2, 0, 1))
    chosen = jnp.take_along_axis(cos_r, idx_hbt[..., None], axis=-1)[..., 0]
    assert jnp.allclose(chosen, jnp.max(cos_r, axis=-1), atol=1e-4), "argmax cosine mismatch"
    assert jnp.mean((indices == idx_r).astype(jnp.float32)) > 0.99, "index mismatch"


def _run_case(B, T, D, H, C, K, seed, check_f32=False, check_idx_only=False):
    key = jax.random.PRNGKey(seed)
    kx, kp, kc = jax.random.split(key, 3)
    x = jax.random.normal(kx, (B, T, D), dtype=jnp.float32)
    std = (2.0 / (D * K + H * K)) ** 0.5
    rand_projs = jax.random.normal(kp, (H, D, K), dtype=jnp.float32) * std
    cb = jax.random.normal(kc, (H, C, K), dtype=jnp.float32)
    cb = cb / jnp.maximum(jnp.linalg.norm(cb, axis=-1, keepdims=True), 1e-12)

    idx_r, cos_r = _reference(x, rand_projs, cb)

    fwd = jax.jit(functools.partial(random_projection_quantizer_v2, return_distances=True))
    indices, distances = fwd(x, rand_projs, cb)
    jax.block_until_ready((indices, distances))
    assert indices.shape == (B, T, H) and distances.shape == (H, B, T, C)
    _check_indices(indices, cos_r, idx_r)
    assert jnp.allclose(distances.astype(jnp.float32), cos_r, atol=1e-2), "bf16 distances"

    if check_f32:
        fwd32 = jax.jit(functools.partial(random_projection_quantizer_v2,
                                          return_distances=True,
                                          distances_dtype=jnp.float32))
        _, dist32 = fwd32(x, rand_projs, cb)
        jax.block_until_ready(dist32)
        assert jnp.allclose(dist32, cos_r, atol=3e-4), "f32 distances mismatch"

    if check_idx_only:
        fwd_idx = jax.jit(functools.partial(random_projection_quantizer_v2,
                                            return_distances=False))
        idx_only = fwd_idx(x, rand_projs, cb)
        jax.block_until_ready(idx_only)
        _check_indices(idx_only, cos_r, idx_r)


if __name__ == "__main__":
    # Small single-tile case (B*T = 16 < 128 -> one full-extent block; C = 64 exercises
    # the padded-codebook masking and the in-kernel :C slice of the distances).
    _run_case(B=2, T=8, D=32, H=2, C=64, K=16, seed=0, check_f32=True, check_idx_only=True)
    # Multi-tile case (B*T = 256 -> two 128-row tiles; resident projection / codebook
    # blocks reused across grid steps; C = 200 -> C_pad = 256 masking; bf16 distances).
    _run_case(B=2, T=128, D=32, H=2, C=200, K=16, seed=1)
    print("KERNEL_OK")
</pallas_src>

<mosaic_0001>
module attributes {stable_mosaic.version = 11 : i64} {
  func.func @_rpq_kernel_dist(%arg0: i32, %arg1: memref<16x32xf32, #tpu.memory_space<vmem>>, %arg2: memref<32x32xf32, #tpu.memory_space<vmem>>, %arg3: memref<32x256xf32, #tpu.memory_space<vmem>>, %arg4: memref<32x32xf32, #tpu.memory_space<vmem>>, %arg5: memref<2x16xi32, #tpu.memory_space<vmem>>, %arg6: memref<2x16x64xbf16, #tpu.memory_space<vmem>>) attributes {dimension_semantics = [#tpu.dimension_semantics<parallel>], iteration_bounds = array<i64: 1>, scalar_prefetch = 0 : i64, scratch_operands = 0 : i64, tpu.core_type = #tpu.core_type<tc>, window_params = [{transform_indices = @transform_0, window_bounds = array<i64: 16, 32>}, {pipeline_mode = #tpu.pipeline_mode<synchronous>, transform_indices = @transform_1, window_bounds = array<i64: 32, 32>}, {pipeline_mode = #tpu.pipeline_mode<synchronous>, transform_indices = @transform_2, window_bounds = array<i64: 32, 256>}, {pipeline_mode = #tpu.pipeline_mode<synchronous>, transform_indices = @transform_3, window_bounds = array<i64: 32, 32>}, {transform_indices = @transform_4, window_bounds = array<i64: 2, 16>}, {transform_indices = @transform_5, window_bounds = array<i64: 2, 16, 64>}]} {
    %c0 = arith.constant 0 : index
    %c0_0 = arith.constant 0 : index
    %0 = vector.load %arg1[%c0, %c0_0] : memref<16x32xf32, #tpu.memory_space<vmem>>, vector<16x32xf32>
    %cst = arith.constant dense<0.000000e+00> : vector<16xf32>
    %1 = vector.multi_reduction <add>, %0, %cst [1] : vector<16x32xf32> to vector<16xf32>
    %2 = vector.shape_cast %1 : vector<16xf32> to vector<16x1xf32>
    %cst_1 = arith.constant 3.200000e+01 : f32
    %3 = vector.broadcast %cst_1 : f32 to vector<16x1xf32>
    %4 = arith.divf %2, %3 : vector<16x1xf32>
    %5 = vector.broadcast %4 : vector<16x1xf32> to vector<16x32xf32>
    %6 = arith.subf %0, %5 : vector<16x32xf32>
    %7 = arith.mulf %6, %6 : vector<16x32xf32>
    %cst_2 = arith.constant dense<0.000000e+00> : vector<16xf32>
    %8 = vector.multi_reduction <add>, %7, %cst_2 [1] : vector<16x32xf32> to vector<16xf32>
    %9 = vector.shape_cast %8 : vector<16xf32> to vector<16x1xf32>
    %cst_3 = arith.constant 3.200000e+01 : f32
    %10 = vector.broadcast %cst_3 : f32 to vector<16x1xf32>
    %11 = arith.divf %9, %10 : vector<16x1xf32>
    %12 = vector.broadcast %4 : vector<16x1xf32> to vector<16x32xf32>
    %13 = arith.subf %0, %12 : vector<16x32xf32>
    %cst_4 = arith.constant 9.99999974E-6 : f32
    %14 = vector.broadcast %cst_4 : f32 to vector<16x1xf32>
    %15 = arith.addf %11, %14 : vector<16x1xf32>
    %16 = math.rsqrt %15 : vector<16x1xf32>
    %17 = vector.broadcast %16 : vector<16x1xf32> to vector<16x32xf32>
    %18 = arith.mulf %13, %17 : vector<16x32xf32>
    %c0_5 = arith.constant 0 : index
    %c0_6 = arith.constant 0 : index
    %19 = vector.load %arg2[%c0_5, %c0_6] : memref<32x32xf32, #tpu.memory_space<vmem>>, vector<32x32xf32>
    %cst_7 = arith.constant dense<0.000000e+00> : vector<16x32xf32>
    %20 = tpu.matmul %18, %19, %cst_7 {dimension_numbers = #tpu.dot_dimension_numbers<[1], [0], [0], [1], [0, 0, 1, 1], [], []>} : vector<16x32xf32>, vector<32x32xf32>, vector<16x32xf32> -> vector<16x32xf32>
    %21 = arith.mulf %20, %20 : vector<16x32xf32>
    %c0_8 = arith.constant 0 : index
    %c0_9 = arith.constant 0 : index
    %22 = vector.load %arg4[%c0_8, %c0_9] : memref<32x32xf32, #tpu.memory_space<vmem>>, vector<32x32xf32>
    %cst_10 = arith.constant dense<0.000000e+00> : vector<16x32xf32>
    %23 = tpu.matmul %21, %22, %cst_10 {dimension_numbers = #tpu.dot_dimension_numbers<[1], [0], [0], [1], [0, 0, 1, 1], [], []>} : vector<16x32xf32>, vector<32x32xf32>, vector<16x32xf32> -> vector<16x32xf32>
    %cst_11 = arith.constant 1.000000e-16 : f32
    %24 = vector.broadcast %cst_11 : f32 to vector<16x32xf32>
    %25 = arith.maximumf %23, %24 : vector<16x32xf32>
    %26 = math.rsqrt %25 : vector<16x32xf32>
    %27 = arith.mulf %20, %26 : vector<16x32xf32>
    %c0_12 = arith.constant 0 : index
    %c0_13 = arith.constant 0 : index
    %28 = vector.load %arg3[%c0_12, %c0_13] : memref<32x256xf32, #tpu.memory_space<vmem>>, vector<32x256xf32>
    %cst_14 = arith.constant dense<0.000000e+00> : vector<16x256xf32>
    %29 = tpu.matmul %27, %28, %cst_14 {dimension_numbers = #tpu.dot_dimension_numbers<[1], [0], [0], [1], [0, 0, 1, 1], [], []>} : vector<16x32xf32>, vector<32x256xf32>, vector<16x256xf32> -> vector<16x256xf32>
    %30 = tpu.iota {dimensions = array<i32: 1>} : vector<16x128xi32>
    %c64_i32 = arith.constant 64 : i32
    %31 = vector.broadcast %c64_i32 : i32 to vector<16x128xi32>
    %32 = arith.cmpi slt, %30, %31 : vector<16x128xi32>
    %33 = vector.extract_strided_slice %29 {offsets = [0, 0], sizes = [16, 128], strides = [1, 1]} : vector<16x256xf32> to vector<16x128xf32>
    %34 = vector.extract_strided_slice %33 {offsets = [0, 0], sizes = [16, 64], strides = [1, 1]} : vector<16x128xf32> to vector<16x64xf32>
    %35 = arith.truncf %34 : vector<16x64xf32> to vector<16x64xbf16>
    %c0_15 = arith.constant 0 : index
    %c0_16 = arith.constant 0 : index
    %c0_17 = arith.constant 0 : index
    %36 = vector.load %arg6[%c0_15, %c0_16, %c0_17] : memref<2x16x64xbf16, #tpu.memory_space<vmem>>, vector<1x16x64xbf16>
    %37 = vector.shape_cast %36 : vector<1x16x64xbf16> to vector<16x64xbf16>
    %38 = vector.shape_cast %35 : vector<16x64xbf16> to vector<1x16x64xbf16>
    tpu.vector_store %arg6[%c0_15, %c0_16, %c0_17], %38 {strides = array<i32>} : memref<2x16x64xbf16, #tpu.memory_space<vmem>>, vector<1x16x64xbf16>,
    %cst_18 = arith.constant 0xFF800000 : f32
    %39 = vector.broadcast %cst_18 : f32 to vector<16x128xf32>
    %40 = arith.select %32, %33, %39 : vector<16x128xi1>, vector<16x128xf32>
    %cst_19 = arith.constant dense<0xFF800000> : vector<16xf32>
    %41 = vector.multi_reduction <maximumf>, %40, %cst_19 [1] : vector<16x128xf32> to vector<16xf32>
    %42 = vector.shape_cast %41 : vector<16xf32> to vector<16x1xf32>
    %43 = vector.broadcast %42 : vector<16x1xf32> to vector<16x128xf32>
    %44 = arith.cmpf oeq, %40, %43 : vector<16x128xf32>
    %c128_i32 = arith.constant 128 : i32
    %45 = vector.broadcast %c128_i32 : i32 to vector<16x128xi32>
    %46 = arith.select %44, %30, %45 : vector<16x128xi1>, vector<16x128xi32>
    %cst_20 = arith.constant dense<2147483647> : vector<16xi32>
    %47 = vector.multi_reduction <minsi>, %46, %cst_20 [1] : vector<16x128xi32> to vector<16xi32>
    %c0_21 = arith.constant 0 : index
    %c0_22 = arith.constant 0 : index
    %48 = vector.load %arg5[%c0_21, %c0_22] : memref<2x16xi32, #tpu.memory_space<vmem>>, vector<1x16xi32>
    %49 = vector.shape_cast %48 : vector<1x16xi32> to vector<16xi32>
    %50 = vector.shape_cast %47 : vector<16xi32> to vector<1x16xi32>
    tpu.vector_store %arg5[%c0_21, %c0_22], %50 {strides = array<i32>} : memref<2x16xi32, #tpu.memory_space<vmem>>, vector<1x16xi32>,
    %51 = vector.extract_strided_slice %29 {offsets = [0, 128], sizes = [16, 128], strides = [1, 1]} : vector<16x256xf32> to vector<16x128xf32>
    %52 = vector.extract_strided_slice %51 {offsets = [0, 0], sizes = [16, 64], strides = [1, 1]} : vector<16x128xf32> to vector<16x64xf32>
    %53 = arith.truncf %52 : vector<16x64xf32> to vector<16x64xbf16>
    %c1 = arith.constant 1 : index
    %c0_23 = arith.constant 0 : index
    %c0_24 = arith.constant 0 : index
    %54 = vector.load %arg6[%c1, %c0_23, %c0_24] : memref<2x16x64xbf16, #tpu.memory_space<vmem>>, vector<1x16x64xbf16>
    %55 = vector.shape_cast %54 : vector<1x16x64xbf16> to vector<16x64xbf16>
    %56 = vector.shape_cast %53 : vector<16x64xbf16> to vector<1x16x64xbf16>
    tpu.vector_store %arg6[%c1, %c0_23, %c0_24], %56 {strides = array<i32>} : memref<2x16x64xbf16, #tpu.memory_space<vmem>>, vector<1x16x64xbf16>,
    %cst_25 = arith.constant 0xFF800000 : f32
    %57 = vector.broadcast %cst_25 : f32 to vector<16x128xf32>
    %58 = arith.select %32, %51, %57 : vector<16x128xi1>, vector<16x128xf32>
    %cst_26 = arith.constant dense<0xFF800000> : vector<16xf32>
    %59 = vector.multi_reduction <maximumf>, %58, %cst_26 [1] : vector<16x128xf32> to vector<16xf32>
    %60 = vector.shape_cast %59 : vector<16xf32> to vector<16x1xf32>
    %61 = vector.broadcast %60 : vector<16x1xf32> to vector<16x128xf32>
    %62 = arith.cmpf oeq, %58, %61 : vector<16x128xf32>
    %c128_i32_27 = arith.constant 128 : i32
    %63 = vector.broadcast %c128_i32_27 : i32 to vector<16x128xi32>
    %64 = arith.select %62, %30, %63 : vector<16x128xi1>, vector<16x128xi32>
    %cst_28 = arith.constant dense<2147483647> : vector<16xi32>
    %65 = vector.multi_reduction <minsi>, %64, %cst_28 [1] : vector<16x128xi32> to vector<16xi32>
    %c1_29 = arith.constant 1 : index
    %c0_30 = arith.constant 0 : index
    %66 = vector.load %arg5[%c1_29, %c0_30] : memref<2x16xi32, #tpu.memory_space<vmem>>, vector<1x16xi32>
    %67 = vector.shape_cast %66 : vector<1x16xi32> to vector<16xi32>
    %68 = vector.shape_cast %65 : vector<16xi32> to vector<1x16xi32>
    tpu.vector_store %arg5[%c1_29, %c0_30], %68 {strides = array<i32>} : memref<2x16xi32, #tpu.memory_space<vmem>>, vector<1x16xi32>,
    return
  }
  func.func @transform_0(%arg0: i32) -> (i32, i32) {
    %c0_i32 = arith.constant 0 : i32
    %c0_i32_0 = arith.constant 0 : i32
    return %arg0, %c0_i32 : i32, i32
  }
  func.func @transform_1(%arg0: i32) -> (i32, i32) {
    %c0_i32 = arith.constant 0 : i32
    %c0_i32_0 = arith.constant 0 : i32
    %c0_i32_1 = arith.constant 0 : i32
    return %c0_i32, %c0_i32_0 : i32, i32
  }
  func.func @transform_2(%arg0: i32) -> (i32, i32) {
    %c0_i32 = arith.constant 0 : i32
    %c0_i32_0 = arith.constant 0 : i32
    %c0_i32_1 = arith.constant 0 : i32
    return %c0_i32, %c0_i32_0 : i32, i32
  }
  func.func @transform_3(%arg0: i32) -> (i32, i32) {
    %c0_i32 = arith.constant 0 : i32
    %c0_i32_0 = arith.constant 0 : i32
    %c0_i32_1 = arith.constant 0 : i32
    return %c0_i32, %c0_i32_0 : i32, i32
  }
  func.func @transform_4(%arg0: i32) -> (i32, i32) {
    %c0_i32 = arith.constant 0 : i32
    %c0_i32_0 = arith.constant 0 : i32
    return %c0_i32, %arg0 : i32, i32
  }
  func.func @transform_5(%arg0: i32) -> (i32, i32, i32) {
    %c0_i32 = arith.constant 0 : i32
    %c0_i32_0 = arith.constant 0 : i32
    %c0_i32_1 = arith.constant 0 : i32
    return %c0_i32, %arg0, %c0_i32_0 : i32, i32, i32
  }
}

</mosaic_0001>

<bundles_post_ra>
// kernel: random_projection_quantizer_v2.1
= control target key start
LH: loop header
LB: loop body
LE: loop exit
PB: predicated region body
PF: predicated region fallthrough
CT: control target
= control target key end

     0   :  { %vm22_vm0 = vcmask 261120   ;;  %s675_s0 = inlined_call_operand.vmem [shape: f32[16,32], index: 0, kind: input, shape index: {}]   ;;  %s676_s1 = inlined_call_operand.vmem [shape: f32[32,32], index: 1, kind: input, shape index: {}]   ;;  %s677_s2 = inlined_call_operand.vmem [shape: f32[32,256], index: 2, kind: input, shape index: {}]   ;;  %s678_s3 = inlined_call_operand.vmem [shape: f32[32,32], index: 3, kind: input, shape index: {}]   ;;  %s679_s4 = inlined_call_operand.vmem [shape: s32[2,16], index: 4, kind: output, shape index: {0}]   ;;  %s680_s5 = inlined_call_operand.hbm [shape: bf16[2,16,64], index: 5, kind: output, shape index: {1}]  }
   0x1   :  { %v20_v0 = vld [vmem:[%s675_s0] sm:$0xff]  ;;  %v21_v1 = vld [vmem:[%s675_s0 + $0x8] sm:$0xff] }
   0x2   :  { %11 = vsyncpa [#allocation3], 0  ;;  %v23_v2 = vsel %vm22_vm0, %v20_v0, 0.0  ;;  %v26_v3 = vsel %vm22_vm0, %v21_v1, 0.0  ;;  %v53_v14 = vld [vmem:[%s676_s1 + $0x18] sm:$0xff]  ;;  %v52_v15 = vld [vmem:[%s676_s1 + $0x10] sm:$0xff]  ;;  %v319_v53 = vlaneseq }
   0x3   :  { %24 = vadd.xlane.f32.xlu0 %v23_v2  ;;  %489 = vmatprep.subr.mxu1 %v53_v14  ;;  %v51_v16 = vld [vmem:[%s676_s1 + $0x8] sm:$0xff]  ;;  %v50_v17 = vld [vmem:[%s676_s1] sm:$0xff]  ;;  %v140_v18 = vld [vmem:[%s678_s3 + $0x18] sm:$0xff]  ;;  %v545_v40 = vmov 0.0   ;;  %vm330_vm2 = vcmask 519168  }
   0x4   :  { %490 = vmatpush3.msra.mxu1 %v53_v14  ;;  %v139_v29 = vld [vmem:[%s678_s3 + $0x10] sm:$0xff]  ;;  %v138_v30 = vld [vmem:[%s678_s3 + $0x8] sm:$0xff]  ;;  %v137_v31 = vld [vmem:[%s678_s3] sm:$0xff]  ;;  %306 = vmatprep.mubr.f32.mxu0 %v545_v40  ;;  %v644_v54 = vand.u32 127, %v319_v53 }
   0x5   :  { %491 = vmatprep.subr.mxu1 %v52_v15  ;;  %v235_v36 = vld [vmem:[%s677_s2 + $0x38] sm:$0xff]  ;;  %v234_v37 = vld [vmem:[%s677_s2 + $0x30] sm:$0xff]  ;;  %v233_v38 = vld [vmem:[%s677_s2 + $0x28] sm:$0xff] }
   0x6   :  { %492 = vmatpush3.msra.mxu1 %v52_v15  ;;  %266 = vmatprep.subr.mxu0 %v235_v36  ;;  %v232_v39 = vld [vmem:[%s677_s2 + $0x20] sm:$0xff]  ;;  %v231_v41 = vld [vmem:[%s677_s2 + $0x18] sm:$0xff]  ;;  %v230_v42 = vld [vmem:[%s677_s2 + $0x10] sm:$0xff]  ;;  %vm321_vm1 = vcmp.lt.s32.totalorder %v644_v54, 64 }
   0x7   :  { %27 = vadd.xlane.f32.xlu0 %v26_v3  ;;  %493 = vmatprep.subr.mxu1 %v51_v16  ;;  %v229_v43 = vld [vmem:[%s677_s2 + $0x8] sm:$0xff]  ;;  %v228_v44 = vld [vmem:[%s677_s2] sm:$0xff]  ;;  %s546_s2 = smov [#allocation2]  }
   0x8   :  { %494 = vmatpush3.msra.mxu1 %v51_v16  ;;  %267 = vmatpush1.msra.mxu0 %v234_v37  ;;  %s450_s25 = sshll.u32 %s546_s2, 4  ;;  %s451_s25 = int_to_ptr.vmem [resolvable:$true] %s450_s25 }
   0x9   :  { %495 = vmatprep.subr.mxu1 %v50_v17  ;;  %268 = vmatprep.subr.mxu0 %v233_v38  ;;  %s523_s26 = scalar_lea.vmem %s451_s25, 256  ;;  %p528_p1 = scmp.lt.s32.totalorder %s451_s25, %s451_s25 }
   0xa   :  { %496 = vmatpush3.msra.mxu1 %v50_v17  ;;  %269 = vmatpush1.msra.mxu0 %v232_v39  ;;  %p524_p0 = scmp.ne.s32.totalorder %s451_s25, %s523_s26  ;;  %p529_p2 = scmp.lt.s32.totalorder %s523_s26, %s523_s26 }
   0xb   :  { %500 = vmatprep.subr.mxu1 %v140_v18  ;;  %270 = vmatprep.subr.mxu0 %v231_v41 }
   0xc   :  { %271 = vmatpush1.msra.mxu0 %v230_v42  ;;  %p530_p3 = por %p529_p2, %p528_p1 }
   0xd   :  { %272 = vmatprep.subr.mxu0 %v229_v43 }
   0xe   :  { %273 = vmatpush1.msra.mxu0 %v228_v44  ;;  %p531_p4 = pnand %p530_p3, %p524_p0 }
  0x8c   :  { %v25_v4 = vpop.xlane.xlu0 %24 }
  0x8d   :  { %v30_v5 = vmul.f32 0.03125, %v25_v4 }
  0x8f   :  { %v32_v6 = vsub.f32 %v20_v0, %v30_v5 }
  0x90   :  { %v28_v7 = vpop.xlane.xlu0 %27 }
  0x91   :  { %v31_v8 = vmul.f32 0.03125, %v28_v7  ;;  %v34_v9 = vmul.f32 %v32_v6, %v32_v6 }
  0x93   :  { %v33_v10 = vsub.f32 %v21_v1, %v31_v8  ;;  %v36_v11 = vsel %vm22_vm0, %v34_v9, 0.0 }
  0x94   :  { %37 = vadd.xlane.f32.xlu1 %v36_v11 }
  0x95   :  { %v35_v12 = vmul.f32 %v33_v10, %v33_v10 }
  0x97   :  { %v39_v13 = vsel %vm22_vm0, %v35_v12, 0.0 }
  0x98   :  { %40 = vadd.xlane.f32.xlu1 %v39_v13 }
 0x11d   :  { %v38_v19 = vpop.xlane.xlu1 %37 }
 0x11e   :  { %v42_v20 = vmul.f32 0.03125, %v38_v19 }
 0x120   :  { %v44_v21 = vadd.f32 1e-05, %v42_v20 }
 0x121   :  { %v41_v22 = vpop.xlane.xlu1 %40 }
 0x122   :  { %515 = vrsqrt.f32 %v44_v21  ;;  %v43_v23 = vmul.f32 0.03125, %v41_v22 }
 0x124   :  { %v45_v24 = vadd.f32 1e-05, %v43_v23 }
 0x126   :  { %517 = vrsqrt.f32 %v45_v24 }
 0x12f   :  { %v516_v25 = vpop.eup %515 }
 0x130   :  { %v48_v26 = vmul.f32 %v516_v25, %v32_v6 }
 0x132   :  { %497 = vmatprep.mubr.msk.f32.mxu1 %vm22_vm0, %v48_v26 }
 0x133   :  { %v518_v27 = vpop.eup %517 }
 0x134   :  { %v49_v28 = vmul.f32 %v518_v27, %v33_v10 }
 0x136   :  { %498 = vmatmul.mubr.msk.f32.vlgmr.msra.gmra.mxu1 %vm22_vm0, %v49_v28 }
 0x137   :  { %501 = vmatpush3.msra.mxu1 %v140_v18 }
 0x138   :  { %502 = vmatprep.subr.mxu1 %v139_v29 }
 0x139   :  { %503 = vmatpush3.msra.mxu1 %v139_v29 }
 0x13a   :  { %504 = vmatprep.subr.mxu1 %v138_v30 }
 0x13b   :  { %505 = vmatpush3.msra.mxu1 %v138_v30 }
 0x13c   :  { %506 = vmatprep.subr.mxu1 %v137_v31 }
 0x13d   :  { %507 = vmatpush3.msra.mxu1 %v137_v31 }
 0x1f6   :  { %v499_v32 = vpop.f32.mrf.mxu1 }
 0x1f7   :  { %v136_v35 = vmul.f32 %v499_v32, %v499_v32 }
 0x1f8   :  { %v126_v33 = vpop.f32.mrf.mxu1 }
 0x1f9   :  { %v135_v34 = vmul.f32 %v126_v33, %v126_v33 }
 0x1fb   :  { %508 = vmatprep.mubr.msk.f32.mxu1 %vm22_vm0, %v135_v34 }
 0x1fc   :  { %509 = vmatmul.mubr.msk.f32.vlgmr.msra.gmra.mxu1 %vm22_vm0, %v136_v35 }
 0x2bc   :  { %v510_v45 = vpop.f32.mrf.mxu1 }
 0x2bd   :  { %v223_v47 = vmax.f32 %v510_v45, 1e-16 }
 0x2be   :  { %v213_v46 = vpop.f32.mrf.mxu1 }
 0x2bf   :  { %v222_v48 = vmax.f32 %v213_v46, 1e-16 }
 0x2c1   :  { %519 = vrsqrt.f32 %v222_v48 }
 0x2c2   :  { %521 = vrsqrt.f32 %v223_v47 }
 0x2ce   :  { %v520_v49 = vpop.eup %519 }
 0x2cf   :  { %v226_v50 = vmul.f32 %v520_v49, %v126_v33  ;;  %v522_v51 = vpop.eup %521 }
 0x2d0   :  { %v227_v52 = vmul.f32 %v522_v51, %v499_v32 }
 0x2d1   :  { %467 = vmatmul.mubr.msk.f32.vlgmr.msra.gmra.mxu0 %vm22_vm0, %v226_v50 }
 0x2d2   :  { %312 = vmatprep.mubr.f32.mxu0 %v545_v40 }
 0x2d5   :  { %468 = vmatmul.mubr.msk.f32.gmra.mxu0 %vm22_vm0, %v227_v52 }
 0x391   :  { %v308_v55 = vpop.f32.mrf.mxu0 }
 0x392   :  { %v473_v56 = vpack.c.bf16 %v308_v55, %v308_v55  ;;  %v333_v57 = vsel %vm321_vm1, %v308_v55, -inf }
 0x393   :  { %335 = vmax.xlane.f32.xlu0 %v333_v57  ;;  %v310_v58 = vpop.f32.mrf.mxu0 }
 0x394   :  { %331 = vst.msk [vmem:[#allocation2] sm:$0xf] %vm330_vm2, %v473_v56  ;;  %v475_v59 = vpack.c.bf16 %v310_v58, %v310_v58  ;;  %v395_v62 = vsel %vm321_vm1, %v310_v58, -inf }
 0x395   :  { %v314_v60 = vpop.f32.mrf.mxu0 }
 0x396   :  { %393 = vst.msk [vmem:[#allocation2 + $0x8] sm:$0xf] %vm330_vm2, %v475_v59  ;;  %v474_v61 = vpack.c.bf16 %v314_v60, %v314_v60  ;;  %v334_v63 = vsel %vm321_vm1, %v314_v60, -inf }
 0x397   :  { %397 = vmax.xlane.f32.xlu0 %v395_v62  ;;  %337 = vmax.xlane.f32.xlu1 %v334_v63  ;;  %v316_v0 = vpop.f32.mrf.mxu0 }
 0x398   :  { %332 = vst.msk [vmem:[#allocation2 + $0x4] sm:$0xf] %vm330_vm2, %v474_v61  ;;  %v476_v1 = vpack.c.bf16 %v316_v0, %v316_v0  ;;  %v396_v2 = vsel %vm321_vm1, %v316_v0, -inf }
 0x39a   :  { %394 = vst.msk [vmem:[#allocation2 + $0xc] sm:$0xf] %vm330_vm2, %v476_v1 }
 0x39b   :  { %399 = vmax.xlane.f32.xlu1 %v396_v2 }
 0x41c   :  { %v336_v3 = vpop.xlane.xlu0 %335 }
 0x41d   :  { %vm339_vm3 = vcmp.eq.f32.partialorder %v333_v57, %v336_v3 }
 0x41e   :  { %v341_v4 = vsel %vm339_vm3, %v644_v54, 128 }
 0x41f   :  { %v344_v5 = vshra.s32 %v341_v4, 16  ;;  %v343_v19 = vand.u32 65535, %v341_v4 }
 0x420   :  { %v398_v6 = vpop.xlane.xlu0 %397  ;;  %v338_v7 = vpop.xlane.xlu1 %337 }
 0x421   :  { %vm401_vm4 = vcmp.eq.f32.partialorder %v395_v62, %v398_v6  ;;  %vm340_vm5 = vcmp.eq.f32.partialorder %v334_v63, %v338_v7  ;;  %v346_v8 = vcvt.s32.f32 %v344_v5  ;;  %v345_v23 = vcvt.s32.f32 %v343_v19 }
 0x422   :  { %v403_v9 = vsel %vm401_vm4, %v644_v54, 128  ;;  %v342_v10 = vsel %vm340_vm5, %v644_v54, 128 }
 0x423   :  { %347 = vmin.xlane.f32.xlu0 %v346_v8  ;;  %v406_v11 = vshra.s32 %v403_v9, 16  ;;  %v358_v12 = vshra.s32 %v342_v10, 16  ;;  %v405_v20 = vand.u32 65535, %v403_v9  ;;  %v357_v21 = vand.u32 65535, %v342_v10 }
 0x424   :  { %v400_v13 = vpop.xlane.xlu1 %399 }
 0x425   :  { %vm402_vm6 = vcmp.eq.f32.partialorder %v396_v2, %v400_v13  ;;  %v408_v14 = vcvt.s32.f32 %v406_v11  ;;  %v360_v15 = vcvt.s32.f32 %v358_v12  ;;  %v407_v28 = vcvt.s32.f32 %v405_v20 }
 0x426   :  { %v404_v16 = vsel %vm402_vm6, %v644_v54, 128  ;;  %v359_v29 = vcvt.s32.f32 %v357_v21 }
 0x427   :  { %409 = vmin.xlane.f32.xlu0 %v408_v14  ;;  %361 = vmin.xlane.f32.xlu1 %v360_v15  ;;  %v420_v17 = vshra.s32 %v404_v16, 16  ;;  %v419_v25 = vand.u32 65535, %v404_v16 }
 0x429   :  { %v422_v18 = vcvt.s32.f32 %v420_v17  ;;  %v421_v33 = vcvt.s32.f32 %v419_v25 }
 0x42b   :  { %423 = vmin.xlane.f32.xlu1 %v422_v18 }
 0x4ac   :  { %v348_v22 = vpop.xlane.xlu0 %347 }
 0x4ad   :  { %vm349_vm7 = vcmp.eq.f32.partialorder %v346_v8, %v348_v22 }
 0x4ae   :  { %v350_v24 = vsel %vm349_vm7, %v345_v23, inf }
 0x4af   :  { %351 = vmin.xlane.f32.xlu0 %v350_v24 }
 0x4b0   :  { %v410_v26 = vpop.xlane.xlu0 %409  ;;  %v362_v27 = vpop.xlane.xlu1 %361 }
 0x4b1   :  { %vm411_vm8 = vcmp.eq.f32.partialorder %v408_v14, %v410_v26  ;;  %vm363_vm9 = vcmp.eq.f32.partialorder %v360_v15, %v362_v27 }
 0x4b2   :  { %v412_v30 = vsel %vm411_vm8, %v407_v28, inf  ;;  %v364_v31 = vsel %vm363_vm9, %v359_v29, inf }
 0x4b3   :  { %413 = vmin.xlane.f32.xlu0 %v412_v30  ;;  %365 = vmin.xlane.f32.xlu1 %v364_v31 }
 0x4b4   :  { %v424_v32 = vpop.xlane.xlu1 %423 }
 0x4b5   :  { %vm425_vm10 = vcmp.eq.f32.partialorder %v422_v18, %v424_v32 }
 0x4b6   :  { %v426_v34 = vsel %vm425_vm10, %v421_v33, inf }
 0x4b7   :  { %427 = vmin.xlane.f32.xlu1 %v426_v34 }
 0x4b8   :  { %534 = shalt.err (!%p531_p4)
}
 0x4b9   :  { %s547_s27 = smov 64   ;;  %s548_s28 = smov 4   ;;  %v354_v35 = vcvt.f32.s32 %v348_v22  ;;  %v368_v36 = vcvt.f32.s32 %v362_v27  ;;  %v372_v37 = vshrl.u32 %v319_v53, 7  ;;  %v375_v40 = vadd.s32 4294967288, %v644_v54 }
 0x4ba   :  { %456 = dma.vmem_to_hbm [thread:$0]  %s451_s25, 256, %s680_s5, [#allocation3], %s547_s27, %s547_s27, %s548_s28   ;;  %v416_v42 = vcvt.f32.s32 %v410_v26  ;;  %v430_v44 = vcvt.f32.s32 %v424_v32  ;;  %vm380_vm11 = vcmask 130112   ;;  %vm382_vm12 = vcmask 122880  }
 0x4bb   :  { %v355_v41 = vshll.u32 %v354_v35, 16  ;;  %v369_v43 = vshll.u32 %v368_v36, 16  ;;  %v373_v45 = vsub.s32 %v644_v54, %v372_v37  ;;  %v378_v50 = vsub.s32 %v375_v40, %v372_v37 }
 0x4bc   :  { %v417_v52 = vshll.u32 %v416_v42, 16  ;;  %v431_v56 = vshll.u32 %v430_v44, 16 }
 0x538   :  { %v352_v38 = vpop.xlane.xlu0 %351 }
 0x539   :  { %v353_v39 = vcvt.f32.s32 %v352_v38 }
 0x53b   :  { %v356_v48 = vadd.s32 %v355_v41, %v353_v39 }
 0x53c   :  { %v414_v46 = vpop.xlane.xlu0 %413  ;;  %v366_v47 = vpop.xlane.xlu1 %365 }
 0x53d   :  { %v415_v49 = vcvt.f32.s32 %v414_v46  ;;  %v367_v51 = vcvt.f32.s32 %v366_v47  ;;  %v374_v57 = vrot.slane %v356_v48, %v373_v45 }
 0x53f   :  { %v370_v55 = vadd.s32 %v369_v43, %v367_v51  ;;  %v418_v58 = vadd.s32 %v417_v52, %v415_v49 }
 0x540   :  { %v428_v53 = vpop.xlane.xlu1 %427 }
 0x541   :  { %v379_v59 = vrot.slane %v370_v55, %v378_v50  ;;  %v429_v60 = vcvt.f32.s32 %v428_v53  ;;  %v436_v54 = vrot.slane %v418_v58, %v373_v45 }
 0x543   :  { %v381_v61 = vsel %vm380_vm11, %v379_v59, %v374_v57  ;;  %v432_v62 = vadd.s32 %v431_v56, %v429_v60 }
 0x544   :  { %383 = vst.msk [vmem:[%s679_s4] sm:$0x1] %vm382_vm12, %v381_v61 }
 0x545   :  { %v440_v63 = vrot.slane %v432_v62, %v378_v50 }
 0x547   :  { %v441_v0 = vsel %vm380_vm11, %v440_v63, %v436_v54 }
 0x548   :  { %442 = vst.msk [vmem:[%s679_s4 + $0x1] sm:$0x1] %vm382_vm12, %v441_v0 }
 0x549   :  { %543 = dma.done.wait [#allocation3], 256  }
 0x54a   :  { %544 = vsyncadd [#allocation3], 4294967040 }
 0x54b   :  { %462 = vsyncpa [#allocation3], 1 }

</bundles_post_ra>
